<compile_context>
chip_gen: v5e
topology: v5e:2x2
jax: 0.10.0
libtpu: 0.0.40
codegen_flags: <defaults>
</compile_context>

<pallas_src>
import jax
import jax.numpy as jnp
from jax import lax
from jax.experimental import pallas as pl
from jax.experimental.pallas import tpu as pltpu

EPS = 1e-5
NEG_SLOPE = 0.2


def _round_up(a, b):
    return -(-a // b) * b


def _cdiv(a, b):
    return -(-a // b)


def _pick_s_tile(ckk, s):
    """Largest 128-aligned lane tile (<=2048) whose double-buffered bf16 patch
    tile stays under ~16 MiB, balanced over the resulting number of tiles."""
    max_tile = 2048
    while max_tile > 128 and 2 * ckk * max_tile * 2 > (16 << 20):
        max_tile //= 2
    n_tiles = _cdiv(s, max_tile)
    tile_s = _round_up(_cdiv(s, n_tiles), 128)
    return tile_s, n_tiles


def _pick_cout_tile(cout, s_pad, slab_budget_bytes):
    """Largest Cout tile (multiple of 8, dividing Cout) whose double-buffered
    bf16 resident output slab fits the budget."""
    def fits(c):
        return 2 * c * s_pad * 2 <= slab_budget_bytes

    if cout <= 256 and fits(cout):
        return cout
    for c in (256, 128, 64, 32, 16, 8):
        if c < cout and cout % c == 0 and fits(c):
            return c
    for c in (8, 16, 32, 64, 128, 256):      # nothing fits: smallest divisor
        if c < cout and cout % c == 0:
            return c
    return cout


def _vmem_capacity_bytes():
    try:
        cap = getattr(pltpu.get_tpu_info(), "vmem_capacity_bytes", None)
        if cap:
            return int(cap)
    except Exception:
        pass
    return 64 << 20   # conservative fallback (v7x physical VMEM per core)


def _make_kernel(tile_s, n_s_tiles, s_true):
    inv_s = 1.0 / float(s_true)   # true spatial size (padded columns are zero)

    def kernel(w_ref, p_ref, g_ref, b_ref, o_ref, sum_ref, sq_ref):
        # w_ref : (Cout_t, CKK)       bf16
        # p_ref : (1, CKK, tile_s)    bf16
        # g_ref : (Cout_t, 1)         f32
        # b_ref : (Cout_t, 1)         f32
        # o_ref : (1, Cout_t, s_pad)  bf16  (VMEM-resident across the s sweep)
        # sum_ref, sq_ref : (Cout_t, 1) f32 scratch (streamed channel stats)
        s = pl.program_id(2)

        @pl.when(s == 0)
        def _init():
            sum_ref[...] = jnp.zeros_like(sum_ref)
            sq_ref[...] = jnp.zeros_like(sq_ref)

        # Conv tile on the MXU (bf16 in, f32 accumulate): (Cout_t, tile_s).
        y = jnp.dot(w_ref[...], p_ref[0], preferred_element_type=jnp.float32)

        # Streaming per-channel stats from the f32 matmul result
        # (zero-padded spatial columns contribute nothing).
        sum_ref[...] += jnp.sum(y, axis=1, keepdims=True)
        sq_ref[...] += jnp.sum(y * y, axis=1, keepdims=True)

        start = pl.multiple_of(s * tile_s, tile_s)
        o_ref[0, :, pl.ds(start, tile_s)] = y.astype(o_ref.dtype)

        @pl.when(s == pl.num_programs(2) - 1)
        def _finalize():
            mean = sum_ref[...] * inv_s                  # (Cout_t, 1)
            var = sq_ref[...] * inv_s - mean * mean      # biased variance
            scale = g_ref[...] * lax.rsqrt(var + EPS)    # gamma / std
            shift = b_ref[...] - mean * scale            # beta - mean*scale

            # Chunked epilogue: norm + affine + LeakyReLU one tile_s slice at
            # a time (bounded vreg pressure, overlappable loads/stores).
            def _chunk(i, carry):
                st = pl.multiple_of(i * tile_s, tile_s)
                blk = o_ref[0, :, pl.ds(st, tile_s)].astype(jnp.float32)
                out = blk * scale + shift
                o_ref[0, :, pl.ds(st, tile_s)] = jnp.where(
                    out >= 0, out, NEG_SLOPE * out).astype(o_ref.dtype)
                return carry

            lax.fori_loop(0, n_s_tiles, _chunk, 0)

    return kernel


def cnn_block(x, weight, gamma, beta, stride=2):
    """x: (N, Cin, H, W); weight: (Cout, Cin, K, K); gamma/beta: (Cout,).
    Returns bf16 NCHW activations of fused Conv -> InstanceNorm -> LeakyReLU."""
    N, Cin, H, W = x.shape
    Cout, _, K, _ = weight.shape
    OH = (H - K) // stride + 1
    OW = (W - K) // stride + 1
    S = OH * OW
    CKK = Cin * K * K

    # im2col -> (N, Cin*K*K, OH*OW); feature ordering (Cin, KH, KW) matches
    # weight.reshape(Cout, Cin*K*K).  bf16 halves HBM traffic into the kernel.
    # (padding_mode='reflect' is a no-op here: the conv has padding=0.)
    # TODO(synk): eliminate this materialized im2col via K*K strided in-kernel matmuls.
    patches = lax.conv_general_dilated_patches(
        x.astype(jnp.bfloat16), filter_shape=(K, K),
        window_strides=(stride, stride), padding="VALID")
    patches = patches.reshape(N, CKK, S)

    # Spatial (lane) tiling; pad S with zero columns (stats divide by true S).
    tile_s, n_s_tiles = _pick_s_tile(CKK, S)
    s_pad = n_s_tiles * tile_s
    if s_pad != S:
        patches = jnp.pad(patches, ((0, 0), (0, 0), (0, s_pad - S)))

    # Channel tiling: per-channel stats -> Cout tiles are independent.
    co_tile = _pick_cout_tile(Cout, s_pad, slab_budget_bytes=(12 << 20))
    n_co_tiles = Cout // co_tile

    w2d = weight.reshape(Cout, CKK).astype(jnp.bfloat16)   # (Cout, CKK)
    g2d = gamma.reshape(Cout, 1).astype(jnp.float32)
    b2d = beta.reshape(Cout, 1).astype(jnp.float32)

    # VMEM limit derived from actual (double-buffered) buffer sizes, capped by
    # the device's physical VMEM capacity.
    needed = (2 * (co_tile * CKK * 2)        # weights
              + 2 * (CKK * tile_s * 2)       # patches tile
              + 2 * (co_tile * s_pad * 2)    # resident bf16 output slab
              + 8 * (co_tile * 4)            # gamma/beta + stats scratch
              + (4 << 20))                   # headroom
    vmem_limit = int(min(int(0.9 * _vmem_capacity_bytes()),
                         max(needed, 32 << 20)))

    out = pl.pallas_call(
        _make_kernel(tile_s, n_s_tiles, S),
        out_shape=jax.ShapeDtypeStruct((N, Cout, s_pad), jnp.bfloat16),
        grid_spec=pltpu.PrefetchScalarGridSpec(
            num_scalar_prefetch=0,
            grid=(N, n_co_tiles, n_s_tiles),
            in_specs=[
                pl.BlockSpec((co_tile, CKK), lambda n, co, s: (co, 0)),
                pl.BlockSpec((1, CKK, tile_s), lambda n, co, s: (n, 0, s)),
                pl.BlockSpec((co_tile, 1), lambda n, co, s: (co, 0)),
                pl.BlockSpec((co_tile, 1), lambda n, co, s: (co, 0)),
            ],
            out_specs=pl.BlockSpec((1, co_tile, s_pad),
                                   lambda n, co, s: (n, co, 0)),
            scratch_shapes=[pltpu.VMEM((co_tile, 1), jnp.float32),
                            pltpu.VMEM((co_tile, 1), jnp.float32)],
        ),
        compiler_params=pltpu.CompilerParams(
            dimension_semantics=("parallel", "parallel", "arbitrary"),
            vmem_limit_bytes=vmem_limit,
            allow_input_fusion=[False, True, False, False]),
    )(w2d, patches, g2d, b2d)

    # (N, Cout, s_pad) -> drop padded columns -> NCHW via plain reshape.
    return out[:, :, :S].reshape(N, Cout, OH, OW)


def _reference(x, weight, gamma, beta, stride=2):
    y = lax.conv_general_dilated(
        x, weight, window_strides=(stride, stride), padding="VALID",
        dimension_numbers=("NCHW", "OIHW", "NCHW"))
    mean = jnp.mean(y, axis=(2, 3), keepdims=True)
    var = jnp.mean((y - mean) ** 2, axis=(2, 3), keepdims=True)
    yh = (y - mean) * lax.rsqrt(var + EPS)
    yh = yh * gamma.reshape(1, -1, 1, 1) + beta.reshape(1, -1, 1, 1)
    return jnp.where(yh >= 0, yh, NEG_SLOPE * yh)


if __name__ == "__main__":
    key = jax.random.PRNGKey(0)
    k_x, k_w, k_g, k_b = jax.random.split(key, 4)

    N, Cin, H, W = 2, 4, 16, 16
    Cout, K, stride = 8, 4, 2

    x = jax.random.normal(k_x, (N, Cin, H, W), dtype=jnp.float32)
    weight = jax.random.normal(k_w, (Cout, Cin, K, K), dtype=jnp.float32) * 0.1
    gamma = 1.0 + 0.1 * jax.random.normal(k_g, (Cout,), dtype=jnp.float32)
    beta = 0.1 * jax.random.normal(k_b, (Cout,), dtype=jnp.float32)

    out = jax.block_until_ready(cnn_block(x, weight, gamma, beta, stride))
    ref = jax.block_until_ready(_reference(x, weight, gamma, beta, stride))

    assert out.shape == (N, Cout, (H - K) // stride + 1, (W - K) // stride + 1)
    # bf16 MXU operands + bf16 activation slab -> loose tolerance vs f32 ref.
    err = jnp.max(jnp.abs(out.astype(jnp.float32) - ref))
    assert jnp.allclose(out.astype(jnp.float32), ref, atol=5e-2, rtol=5e-2), float(err)
    print("KERNEL_OK")
</pallas_src>

<mosaic_0001>
module attributes {stable_mosaic.version = 11 : i64} {
  func.func @kernel(%arg0: i32, %arg1: i32, %arg2: i32, %arg3: memref<8x64xbf16, #tpu.memory_space<vmem>>, %arg4: memref<1x64x128xbf16, #tpu.memory_space<vmem>>, %arg5: memref<8x1xf32, #tpu.memory_space<vmem>>, %arg6: memref<8x1xf32, #tpu.memory_space<vmem>>, %arg7: memref<1x8x128xbf16, #tpu.memory_space<vmem>>, %arg8: memref<8x1xf32, #tpu.memory_space<vmem>>, %arg9: memref<8x1xf32, #tpu.memory_space<vmem>>) attributes {dimension_semantics = [#tpu.dimension_semantics<parallel>, #tpu.dimension_semantics<parallel>, #tpu.dimension_semantics<arbitrary>], iteration_bounds = array<i64: 2, 1, 1>, scalar_prefetch = 0 : i64, scratch_operands = 2 : i64, tpu.core_type = #tpu.core_type<tc>, window_params = [{transform_indices = @transform_0, window_bounds = array<i64: 8, 64>}, {transform_indices = @transform_1, window_bounds = array<i64: 1, 64, 128>}, {transform_indices = @transform_2, window_bounds = array<i64: 8, 1>}, {transform_indices = @transform_3, window_bounds = array<i64: 8, 1>}, {transform_indices = @transform_4, window_bounds = array<i64: 1, 8, 128>}]} {
    %c0_i32 = arith.constant 0 : i32
    %0 = arith.cmpi eq, %arg2, %c0_i32 : i32
    %1 = arith.extui %0 : i1 to i32
    %c0_i32_0 = arith.constant 0 : i32
    %2 = arith.cmpi ne, %1, %c0_i32_0 : i32
    scf.if %2 {
      %cst_19 = arith.constant 0.000000e+00 : f32
      %28 = vector.broadcast %cst_19 : f32 to vector<8x1xf32>
      %c0_20 = arith.constant 0 : index
      %c0_21 = arith.constant 0 : index
      %29 = vector.load %arg8[%c0_20, %c0_21] : memref<8x1xf32, #tpu.memory_space<vmem>>, vector<8x1xf32>
      tpu.vector_store %arg8[%c0_20, %c0_21], %28 {strides = array<i32>} : memref<8x1xf32, #tpu.memory_space<vmem>>, vector<8x1xf32>,
      %cst_22 = arith.constant 0.000000e+00 : f32
      %30 = vector.broadcast %cst_22 : f32 to vector<8x1xf32>
      %c0_23 = arith.constant 0 : index
      %c0_24 = arith.constant 0 : index
      %31 = vector.load %arg9[%c0_23, %c0_24] : memref<8x1xf32, #tpu.memory_space<vmem>>, vector<8x1xf32>
      tpu.vector_store %arg9[%c0_23, %c0_24], %30 {strides = array<i32>} : memref<8x1xf32, #tpu.memory_space<vmem>>, vector<8x1xf32>,
    } else {
    }
    %c0 = arith.constant 0 : index
    %c0_1 = arith.constant 0 : index
    %3 = vector.load %arg3[%c0, %c0_1] : memref<8x64xbf16, #tpu.memory_space<vmem>>, vector<8x64xbf16>
    %c0_2 = arith.constant 0 : index
    %c0_3 = arith.constant 0 : index
    %c0_4 = arith.constant 0 : index
    %4 = vector.load %arg4[%c0_2, %c0_3, %c0_4] : memref<1x64x128xbf16, #tpu.memory_space<vmem>>, vector<1x64x128xbf16>
    %5 = vector.shape_cast %4 : vector<1x64x128xbf16> to vector<64x128xbf16>
    %cst = arith.constant dense<0.000000e+00> : vector<8x128xf32>
    %6 = tpu.matmul %3, %5, %cst {dimension_numbers = #tpu.dot_dimension_numbers<[1], [0], [0], [1], [0, 0, 1, 1], [], []>} : vector<8x64xbf16>, vector<64x128xbf16>, vector<8x128xf32> -> vector<8x128xf32>
    %c0_5 = arith.constant 0 : index
    %c0_6 = arith.constant 0 : index
    %7 = vector.load %arg8[%c0_5, %c0_6] : memref<8x1xf32, #tpu.memory_space<vmem>>, vector<8x1xf32>
    %cst_7 = arith.constant dense<0.000000e+00> : vector<8xf32>
    %8 = vector.multi_reduction <add>, %6, %cst_7 [1] : vector<8x128xf32> to vector<8xf32>
    %9 = vector.shape_cast %8 : vector<8xf32> to vector<8x1xf32>
    %10 = arith.addf %7, %9 : vector<8x1xf32>
    %c0_8 = arith.constant 0 : index
    %c0_9 = arith.constant 0 : index
    %11 = vector.load %arg8[%c0_8, %c0_9] : memref<8x1xf32, #tpu.memory_space<vmem>>, vector<8x1xf32>
    tpu.vector_store %arg8[%c0_8, %c0_9], %10 {strides = array<i32>} : memref<8x1xf32, #tpu.memory_space<vmem>>, vector<8x1xf32>,
    %c0_10 = arith.constant 0 : index
    %c0_11 = arith.constant 0 : index
    %12 = vector.load %arg9[%c0_10, %c0_11] : memref<8x1xf32, #tpu.memory_space<vmem>>, vector<8x1xf32>
    %13 = arith.mulf %6, %6 : vector<8x128xf32>
    %cst_12 = arith.constant dense<0.000000e+00> : vector<8xf32>
    %14 = vector.multi_reduction <add>, %13, %cst_12 [1] : vector<8x128xf32> to vector<8xf32>
    %15 = vector.shape_cast %14 : vector<8xf32> to vector<8x1xf32>
    %16 = arith.addf %12, %15 : vector<8x1xf32>
    %c0_13 = arith.constant 0 : index
    %c0_14 = arith.constant 0 : index
    %17 = vector.load %arg9[%c0_13, %c0_14] : memref<8x1xf32, #tpu.memory_space<vmem>>, vector<8x1xf32>
    tpu.vector_store %arg9[%c0_13, %c0_14], %16 {strides = array<i32>} : memref<8x1xf32, #tpu.memory_space<vmem>>, vector<8x1xf32>,
    %c128_i32 = arith.constant 128 : i32
    %18 = arith.muli %arg2, %c128_i32 : i32
    %19 = tpu.assume_multiple %18, 128 : i32
    %20 = arith.truncf %6 : vector<8x128xf32> to vector<8x128xbf16>
    %c0_15 = arith.constant 0 : index
    %c0_16 = arith.constant 0 : index
    %21 = arith.index_cast %19 : i32 to index
    %22 = vector.load %arg7[%c0_15, %c0_16, %21] : memref<1x8x128xbf16, #tpu.memory_space<vmem>>, vector<1x8x128xbf16>
    %23 = vector.shape_cast %22 : vector<1x8x128xbf16> to vector<8x128xbf16>
    %24 = vector.shape_cast %20 : vector<8x128xbf16> to vector<1x8x128xbf16>
    tpu.vector_store %arg7[%c0_15, %c0_16, %21], %24 {strides = array<i32>} : memref<1x8x128xbf16, #tpu.memory_space<vmem>>, vector<1x8x128xbf16>,
    %c0_i32_17 = arith.constant 0 : i32
    %25 = arith.cmpi eq, %arg2, %c0_i32_17 : i32
    %26 = arith.extui %25 : i1 to i32
    %c0_i32_18 = arith.constant 0 : i32
    %27 = arith.cmpi ne, %26, %c0_i32_18 : i32
    scf.if %27 {
      %c0_19 = arith.constant 0 : index
      %c0_20 = arith.constant 0 : index
      %28 = vector.load %arg8[%c0_19, %c0_20] : memref<8x1xf32, #tpu.memory_space<vmem>>, vector<8x1xf32>
      %cst_21 = arith.constant 0.0204081628 : f32
      %29 = vector.broadcast %cst_21 : f32 to vector<8x1xf32>
      %30 = arith.mulf %28, %29 : vector<8x1xf32>
      %c0_22 = arith.constant 0 : index
      %c0_23 = arith.constant 0 : index
      %31 = vector.load %arg9[%c0_22, %c0_23] : memref<8x1xf32, #tpu.memory_space<vmem>>, vector<8x1xf32>
      %cst_24 = arith.constant 0.0204081628 : f32
      %32 = vector.broadcast %cst_24 : f32 to vector<8x1xf32>
      %33 = arith.mulf %31, %32 : vector<8x1xf32>
      %34 = arith.mulf %30, %30 : vector<8x1xf32>
      %35 = arith.subf %33, %34 : vector<8x1xf32>
      %c0_25 = arith.constant 0 : index
      %c0_26 = arith.constant 0 : index
      %36 = vector.load %arg5[%c0_25, %c0_26] : memref<8x1xf32, #tpu.memory_space<vmem>>, vector<8x1xf32>
      %cst_27 = arith.constant 9.99999974E-6 : f32
      %37 = vector.broadcast %cst_27 : f32 to vector<8x1xf32>
      %38 = arith.addf %35, %37 : vector<8x1xf32>
      %39 = math.rsqrt %38 : vector<8x1xf32>
      %40 = arith.mulf %36, %39 : vector<8x1xf32>
      %c0_28 = arith.constant 0 : index
      %c0_29 = arith.constant 0 : index
      %41 = vector.load %arg6[%c0_28, %c0_29] : memref<8x1xf32, #tpu.memory_space<vmem>>, vector<8x1xf32>
      %42 = arith.mulf %30, %40 : vector<8x1xf32>
      %43 = arith.subf %41, %42 : vector<8x1xf32>
      %c0_i32_30 = arith.constant 0 : i32
      %c128_i32_31 = arith.constant 128 : i32
      %44 = arith.muli %c0_i32_30, %c128_i32_31 : i32
      %45 = tpu.assume_multiple %44, 128 : i32
      %c0_32 = arith.constant 0 : index
      %c0_33 = arith.constant 0 : index
      %46 = arith.index_cast %45 : i32 to index
      %47 = vector.load %arg7[%c0_32, %c0_33, %46] : memref<1x8x128xbf16, #tpu.memory_space<vmem>>, vector<1x8x128xbf16>
      %48 = vector.shape_cast %47 : vector<1x8x128xbf16> to vector<8x128xbf16>
      %49 = arith.extf %48 : vector<8x128xbf16> to vector<8x128xf32>
      %50 = vector.broadcast %40 : vector<8x1xf32> to vector<8x128xf32>
      %51 = arith.mulf %49, %50 : vector<8x128xf32>
      %52 = vector.broadcast %43 : vector<8x1xf32> to vector<8x128xf32>
      %53 = arith.addf %51, %52 : vector<8x128xf32>
      %cst_34 = arith.constant 0.000000e+00 : f32
      %54 = vector.broadcast %cst_34 : f32 to vector<8x128xf32>
      %55 = arith.cmpf oge, %53, %54 : vector<8x128xf32>
      %cst_35 = arith.constant 2.000000e-01 : f32
      %56 = vector.broadcast %cst_35 : f32 to vector<8x128xf32>
      %57 = arith.mulf %56, %53 : vector<8x128xf32>
      %58 = arith.select %55, %53, %57 : vector<8x128xi1>, vector<8x128xf32>
      %59 = arith.truncf %58 : vector<8x128xf32> to vector<8x128xbf16>
      %c0_36 = arith.constant 0 : index
      %c0_37 = arith.constant 0 : index
      %60 = arith.index_cast %45 : i32 to index
      %61 = vector.load %arg7[%c0_36, %c0_37, %60] : memref<1x8x128xbf16, #tpu.memory_space<vmem>>, vector<1x8x128xbf16>
      %62 = vector.shape_cast %61 : vector<1x8x128xbf16> to vector<8x128xbf16>
      %63 = vector.shape_cast %59 : vector<8x128xbf16> to vector<1x8x128xbf16>
      tpu.vector_store %arg7[%c0_36, %c0_37, %60], %63 {strides = array<i32>} : memref<1x8x128xbf16, #tpu.memory_space<vmem>>, vector<1x8x128xbf16>,
      %c1_i32 = arith.constant 1 : i32
    } else {
    }
    return
  }
  func.func @transform_0(%arg0: i32, %arg1: i32, %arg2: i32) -> (i32, i32) {
    %c0_i32 = arith.constant 0 : i32
    %c0_i32_0 = arith.constant 0 : i32
    return %arg1, %c0_i32 : i32, i32
  }
  func.func @transform_1(%arg0: i32, %arg1: i32, %arg2: i32) -> (i32, i32, i32) {
    %c0_i32 = arith.constant 0 : i32
    %c0_i32_0 = arith.constant 0 : i32
    return %arg0, %c0_i32, %arg2 : i32, i32, i32
  }
  func.func @transform_2(%arg0: i32, %arg1: i32, %arg2: i32) -> (i32, i32) {
    %c0_i32 = arith.constant 0 : i32
    %c0_i32_0 = arith.constant 0 : i32
    return %arg1, %c0_i32 : i32, i32
  }
  func.func @transform_3(%arg0: i32, %arg1: i32, %arg2: i32) -> (i32, i32) {
    %c0_i32 = arith.constant 0 : i32
    %c0_i32_0 = arith.constant 0 : i32
    return %arg1, %c0_i32 : i32, i32
  }
  func.func @transform_4(%arg0: i32, %arg1: i32, %arg2: i32) -> (i32, i32, i32) {
    %c0_i32 = arith.constant 0 : i32
    %c0_i32_0 = arith.constant 0 : i32
    return %arg0, %arg1, %c0_i32 : i32, i32, i32
  }
}

</mosaic_0001>

<bundles_post_ra>
// kernel: tpu_custom_call.1
= control target key start
LH: loop header
LB: loop body
LE: loop exit
PB: predicated region body
PF: predicated region fallthrough
CT: control target
= control target key end

     0   :  { %9 = vsyncpa [#allocation5], 0  ;;  %s954_s0 = inlined_call_operand.vmem [shape: bf16[8,64], index: 0, kind: input, shape index: {}]   ;;  %s955_s1 = inlined_call_operand.hbm [shape: bf16[2,64,128], index: 1, kind: input, shape index: {}]   ;;  %s956_s2 = inlined_call_operand.vmem [shape: f32[8,1], index: 2, kind: input, shape index: {}]   ;;  %s957_s3 = inlined_call_operand.vmem [shape: f32[8,1], index: 3, kind: input, shape index: {}]   ;;  %s958_s4 = inlined_call_operand.hbm [shape: bf16[2,8,128], index: 4, kind: output, shape index: {}]  }
   0x1   :  { %11 = vsyncpa [#allocation5 + $0x1], 0 }
   0x2   :  { %12 = vsyncpa [#allocation6], 0 }
   0x3   :  { %14 = vsyncpa [#allocation6 + $0x1], 0  ;;  %s814_s15 = smov 0   ;;  %s816_s16 = smov 0  }
   0x4   :  { %s818_s17 = smov 0   ;;  %s820_s18 = smov 0  }
   0x5   :  { %s822_s19 = smov 0   ;;  %s824_s20 = smov 0  }
   0x6 LB: > { %s562_s21 = sadd.s32 4294967295, %s783_s20   ;;  %s563_s22 = sadd.s32 4294967294, %s783_s20   ;;  %s783_s20 = sphi %s824_s20, %s20_s20   ;;  %s779_s19 = sphi %s822_s19, %s967_s19   ;;  %s775_s18 = sphi %s820_s18, %s966_s18   ;;  %s771_s17 = sphi %s818_s17, %s965_s17   ;;  %s767_s16 = sphi %s816_s16, %s964_s16   ;;  %s763_s15 = sphi %s814_s15, %s963_s15  }
   0x7   : > { %s39_s23 = sadd.s32 1, %s779_s19  ;;  %s74_s24 = sadd.s32 1, %s771_s17 }
   0x8   : > { %p41_p0 = scmp.ge.s32.totalorder %s39_s23, 2  ;;  %p81_p1 = scmp.ne.s32.totalorder %s771_s17, %s767_s16 }
   0x9   : > { %p82_p2 = scmp.eq.s32.totalorder %s783_s20, 0  ;;  %p87_p3 = scmp.ne.s32.totalorder %s767_s16, %s763_s15 }
   0xa   : > { %s969_s23 = smov (%p41_p0, %s39_s23), 0  ;;  %p88_p5 = scmp.eq.s32.totalorder %s562_s21, 0 }
   0xb   : > { %p855_p4 = por %p82_p2, %p81_p1  ;;  %s69_s26 = ssub.s32 %s779_s19, %s969_s23 }
   0xc   : > { %p165_p6 = scmp.eq.s32.totalorder %s562_s21, 1  ;;  %p72_p7 = scmp.eq.s32.totalorder %s69_s26, 0 }
   0xd   : > { %p861_p8 = por %p88_p5, %p87_p3  ;;  %p171_p10 = scmp.eq.s32.totalorder %s563_s22, 1 }
   0xe   : > { %p865_p9 = por %p165_p6, %p81_p1  ;;  %p568_p12 = scmp.ge.s32.totalorder %s783_s20, 2 }
   0xf   : > { %s870_s29 = scalar_select %p72_p7, %s771_s17, %s74_s24  }
  0x10   : > { %p872_p11 = por %p171_p10, %p87_p3  ;;  %p613_p13 = scmp.lt.s32.totalorder %s783_s20, 2 }
  0x11   : > { %s212_s5 = sand.u32 1, %s771_s17   ;;  %s596_s7 = sshll.u32 %s779_s19, 5 }
  0x12   : > { %s569_s6 = sshll.u32 %s212_s5, 5  ;;  %s222_s10 = scalar_lea.hbm %s955_s1, %s596_s7 }
  0x13   : > { %s216_s11 = scalar_lea.vmem [#allocation4], %s569_s6  ;;  %s223_s13 = sshll.u32 %s222_s10, 4  ;;  %s224_s13 = int_to_ptr.hbm [resolvable:$true] %s223_s13 }
  0x14   : > { %s225_s12 = sshll.u32 %s216_s11, 4  ;;  %p606_p0 = pnand %p613_p13, %p855_p4  ;;  %s226_s12 = int_to_ptr.vmem [resolvable:$true] %s225_s12 }
  0x15   : > { %p572_p1 = scmp.ge.s32.totalorder %s783_s20, 1  ;;  %s213_s14 = scalar_lea.sflag [#allocation5], %s212_s5 }
  0x16   : > { %s785_s21 = smov 64   ;;  %s786_s22 = smov 4  }
  0x17   : > { %608 = dma.hbm_to_vmem [thread:$0]  (!%p606_p0), %s224_s13, 512, %s226_s12, %s213_s14, %s785_s21, %s785_s21, %s786_s22  }
  0x18   : > { %p233_p2 = scmp.lt.s32.totalorder %s783_s20, 3 }
  0x1a   : > { %p234_p3 = pnand %p572_p1, %p233_p2 }
  0x1b   : > { %s888_s24 = sand.u32 (!%p234_p3), 1, %s767_s16  }
  0x1c   : > { %237 = sbr.rel (%p234_p3) target bundleno = 469 (0x1d5), region = 36  ;;  %s573_s26 = sshll.u32 (!%p234_p3), %s888_s24, 5 }
  0x1d   : > { %s240_s6 = scalar_lea.sflag (!%p234_p3), [#allocation5], %s888_s24  ;;  %s243_s7 = scalar_lea.vmem (!%p234_p3), [#allocation4], %s573_s26 }
  0x21   : > { %754 = dma.done.wait (%p861_p8), %s240_s6, 512  }
  0x22   : > { %756 = vsyncadd (%p861_p8), %s240_s6, 4294966784  ;;  %v600_v0 = vld [vmem:[%s243_s7 + $0x18] sm:$0xff]  ;;  %v599_v1 = vld [vmem:[%s243_s7 + $0x10] sm:$0xff]  ;;  %vm334_vm0 = vcmask 523264   ;;  %vm298_vm1 = vcmask 7168   ;;  %v787_v5 = vmov 0.0  }
  0x23   : > { %342 = vmatpush.bf16.msra.mxu0 %v600_v0  ;;  %v598_v2 = vld [vmem:[%s243_s7 + $0x8] sm:$0xff]  ;;  %v597_v3 = vld [vmem:[%s243_s7] sm:$0xff]  ;;  %v301_v4 = vld [vmem:[%s954_s0] sm:$0xf]  ;;  %299 = vst.msk [vmem:[#allocation2] sm:$0xff] %vm298_vm1, %v787_v5  ;;  %s574_s27 = sshll.u32 %s888_s24, 2 }
  0x24   : > { %300 = vst.msk [vmem:[#allocation3] sm:$0xff] %vm298_vm1, %v787_v5  ;;  %s902_s8 = scalar_lea.vmem [#allocation7], %s574_s27  ;;  %v788_v10 = vmov 0   ;;  %v379_v29 = vld [vmem:[%s956_s2] sm:$0xff]  ;;  %s593_s13 = sshll.u32 %s775_s18, 2 }
  0x25   : > { %667 = vset.pattern.permute.xlu1 %v788_v10  ;;  %668 = vset.pattern.permute.xlu0 %v788_v10  ;;  %v392_v34 = vld [vmem:[%s957_s3] sm:$0xff]  ;;  %s426_s22 = scalar_lea.hbm %s958_s4, %s593_s13  ;;  %s428_s26 = sshll.u32 %s902_s8, 4  ;;  %s429_s26 = int_to_ptr.vmem [resolvable:$true] %s428_s26 }
  0x26   : > { %s430_s6 = sshll.u32 %s426_s22, 4  ;;  %s415_s7 = scalar_lea.sflag [#allocation6], %s888_s24  ;;  %s431_s6 = int_to_ptr.hbm [resolvable:$true] %s430_s6 }
  0x27   : > { %343 = vmatpush.bf16.msra.mxu0 %v599_v1  ;;  %s715_s25 = sshra.s32 %s431_s6, 4  ;;  %s721_s9 = scalar_lea.hbm %s958_s4, 8  ;;  %s716_s25 = int_to_ptr.hbm [resolvable:$true] %s715_s25 }
  0x28   : > { %s717_s18 = scalar_lea.hbm %s716_s25, 4  ;;  %p722_p7 = scmp.lt.s32.totalorder %s716_s25, %s958_s4 }
  0x29   : > { %p718_p4 = scmp.ne.s32.totalorder %s716_s25, %s717_s18  ;;  %p723_p8 = scmp.lt.s32.totalorder %s721_s9, %s717_s18 }
  0x2a   : > { %v351_v11 = vld [vmem:[#allocation2] sm:$0xff] }
  0x2b   : > { %344 = vmatpush.bf16.msra.mxu0 %v598_v2  ;;  %v357_v14 = vld [vmem:[#allocation3] sm:$0xff]  ;;  %p719_p5 = pnand %p718_p4, %p865_p9  ;;  %p724_p10 = por %p723_p8, %p722_p7 }
  0x2d   : > { %p720_p6 = pneg %p719_p5 }
  0x2f   : > { %345 = vmatpush.bf16.msra.mxu0 %v597_v3  ;;  %p725_p13 = pnand %p724_p10, %p720_p6 }
  0x32   : > { %591 = vmatmul.msk.bf16.vlgmr.msra.gmra.mxu0 %vm334_vm0, %v301_v4 }
  0xaf   : > { %v347_v6 = vpop.f32.mrf.mxu0 }
  0xb0   : > { %v364_v7 = vpack.c.bf16 %v347_v6, %v347_v6  ;;  %352 = vadd.xlane.f32.xlu0 %v347_v6  ;;  %v358_v8 = vmul.f32 %v347_v6, %v347_v6 }
  0xb2   : > { %369 = vst [vmem:[%s902_s8] sm:$0xf] %v364_v7 }
  0xb7   : > { %v349_v9 = vpop.f32.mrf.mxu0 }
  0xb8   : > { %359 = vadd.xlane.f32.xlu0 %v358_v8 }
  0xb9   : > { %v395_v37 = vld [vmem:[%s902_s8] sm:$0xf] }
  0xba   : > { %v396_v38 = vunpack.c.l.bf16 %v395_v37 }
 0x123   : > { %v353_v12 = vpop.xlane.xlu0 %352 }
 0x124   : > { %v354_v13 = vadd.f32 %v353_v12, %v351_v11 }
 0x126   : > { %356 = vst.msk [vmem:[#allocation2] sm:$0xff] %vm298_vm1, %v354_v13 }
 0x12b   : > { %v360_v15 = vpop.xlane.xlu0 %359 }
 0x12c   : > { %v361_v16 = vadd.f32 %v360_v15, %v357_v14 }
 0x12d   : > { %v373_v17 = vld [vmem:[#allocation2] sm:$0xff] }
 0x12e   : > { %362 = vst.msk [vmem:[#allocation3] sm:$0xff] %vm298_vm1, %v361_v16  ;;  %v374_v18 = vmul.f32 0.020408163, %v373_v17 }
 0x130   : > { %v377_v21 = vmul.f32 %v374_v18, %v374_v18 }
 0x135   : > { %v375_v19 = vld [vmem:[#allocation3] sm:$0xff] }
 0x136   : > { %v376_v20 = vmul.f32 0.020408163, %v375_v19 }
 0x138   : > { %v378_v22 = vsub.f32 %v376_v20, %v377_v21 }
 0x13a   : > { %v380_v23 = vadd.f32 1e-05, %v378_v22 }
 0x13c   : > { %669 = vrsqrt.f32 %v380_v23  ;;  %vm387_vm3 = vweird.f32 %v380_v23 }
 0x142   : > { %v670_v24 = vpop.eup %669 }
 0x143   : > { %v382_v25 = vmul.f32 %v670_v24, %v380_v23  ;;  %vm388_vm2 = vweird.f32 %v670_v24 }
 0x144   : > { %vm389_vm4 = vmor %vm387_vm3, %vm388_vm2 }
 0x145   : > { %v383_v26 = vmul.f32 %v670_v24, %v382_v25 }
 0x147   : > { %v384_v27 = vmul.f32 0.5, %v383_v26 }
 0x149   : > { %v385_v28 = vsub.f32 1.5, %v384_v27 }
 0x14b   : > { %v386_v30 = vmul.f32 %v670_v24, %v385_v28 }
 0x14d   : > { %v390_v31 = vsel %vm389_vm4, %v670_v24, %v386_v30 }
 0x14e   : > { %v391_v32 = vmul.f32 %v390_v31, %v379_v29 }
 0x150   : > { %399 = vperm.xlu1 %667, %v391_v32   ;;  %v393_v33 = vmul.f32 %v391_v32, %v374_v18 }
 0x152   : > { %v394_v35 = vsub.f32 %v392_v34, %v393_v33 }
 0x158   : > { %405 = vperm.xlu1 %667, %v394_v35  }
 0x1c2   : > { %v400_v36 = vpop.permute.xlu1 %399 }
 0x1c3   : > { %v402_v39 = vmul.f32 %v400_v36, %v396_v38 }
 0x1ca   : > { %v406_v40 = vpop.permute.xlu1 %405 }
 0x1cb   : > { %v408_v41 = vadd.f32 %v406_v40, %v402_v39 }
 0x1cd   : > { %vm409_vm5 = vcmp.ge.f32.partialorder %v408_v41, 0.0  ;;  %v410_v42 = vmul.f32 0.2, %v408_v41 }
 0x1cf   : > { %v411_v43 = vsel %vm409_vm5, %v408_v41, %v410_v42 }
 0x1d0   : > { %v412_v44 = vpack.c.bf16 %v411_v43, %v411_v43 }
 0x1d2   : > { %413 = vst [vmem:[%s902_s8] sm:$0xf] %v412_v44 }
 0x1d3   : > { %728 = shalt.err (!%p725_p13)
}
 0x1d4   : > { %603 = dma.vmem_to_hbm [thread:$0]  (%p865_p9), %s429_s26, 64, %s431_s6, %s415_s7  }
 0x1d5 PF: > { %s442_s24 = sand.u32 1, %s763_s15   ;;  %p610_p0 = pnand %p568_p12, %p872_p11 }
 0x1d6   : > { %s443_s8 = scalar_lea.sflag [#allocation6], %s442_s24 }
 0x1d7   : > { %p611_p1 = pneg %p610_p0 }
 0x1d9   : > { %758 = dma.done.wait (%p611_p1), %s443_s8, 64  }
 0x1da   : > { %760 = vsyncadd (%p611_p1), %s443_s8, 4294967232  ;;  %s20_s20 = sadd.s32 1, %s783_s20   ;;  %s963_s15 = smov %s767_s16 }
 0x1db   : > { %p17_p2 = scmp.ge.s32.totalorder %s20_s20, 4   ;;  %s964_s16 = smov %s771_s17 }
 0x1dc   : > { %s965_s17 = smov %s870_s29  ;;  %s966_s18 = smov %s779_s19 }
 0x1dd   : > { %s967_s19 = smov %s969_s23  ;;  %19 = sbr.rel (!%p17_p2) target bundleno = 6 (0x6), region = 99 }
 0x1e2   :  { %449 = vsyncpa [#allocation5], 1 }
 0x1e3   :  { %451 = vsyncpa [#allocation5 + $0x1], 1 }
 0x1e4   :  { %452 = vsyncpa [#allocation6], 1 }
 0x1e5   :  { %454 = vsyncpa [#allocation6 + $0x1], 1 }

</bundles_post_ra>
